<compile_context>
chip_gen: v7x
topology: tpu7x:2x2x1
jax: 0.10.0
libtpu: 0.0.40
codegen_flags: <defaults>
</compile_context>

<pallas_src>
import math

import numpy as np
import jax
import jax.numpy as jnp
from jax.experimental import pallas as pl
from jax.experimental.pallas import tpu as pltpu

_NUM_BINS = 16
_GEOMETRIC = {"ShearX", "ShearY", "TranslateX", "TranslateY", "Rotate"}
_VMEM_LIMIT = 32 * 1024 * 1024


# --------------------------------------------------------------------------
# TrivialAugmentWide augmentation space (torchvision, num_bins = 16)
# --------------------------------------------------------------------------
def _augmentation_space(num_bins):
    return {
        "Identity": (np.array(0.0), False),
        "ShearX": (np.linspace(0.0, 0.99, num_bins), True),
        "ShearY": (np.linspace(0.0, 0.99, num_bins), True),
        "TranslateX": (np.linspace(0.0, 32.0, num_bins), True),
        "TranslateY": (np.linspace(0.0, 32.0, num_bins), True),
        "Rotate": (np.linspace(0.0, 135.0, num_bins), True),
        "Brightness": (np.linspace(0.0, 0.99, num_bins), True),
        "Color": (np.linspace(0.0, 0.99, num_bins), True),
        "Contrast": (np.linspace(0.0, 0.99, num_bins), True),
        "Posterize": (8 - np.round(np.arange(num_bins) / ((num_bins - 1) / 6)), False),
        "Solarize": (np.linspace(255.0, 0.0, num_bins), False),
        "AutoContrast": (np.array(0.0), False),
        # "Sharpness" / "Equalize": see TODO(synk) above.
    }


# --------------------------------------------------------------------------
# Geometric path: inverse-affine matrix + bicubic resampling weight matrix
# --------------------------------------------------------------------------
def _inverse_affine_matrix(center, angle, translate, scale, shear):
    # Faithful port of torchvision _get_inverse_affine_matrix.
    rot = math.radians(angle)
    sx, sy = (math.radians(s) for s in shear)
    cx, cy = center
    tx, ty = translate
    a = math.cos(rot - sy) / math.cos(sy)
    b = -math.cos(rot - sy) * math.tan(sx) / math.cos(sy) - math.sin(rot)
    c = math.sin(rot - sy) / math.cos(sy)
    d = -math.sin(rot - sy) * math.tan(sx) / math.cos(sy) + math.cos(rot)
    m = [d, -b, 0.0, -c, a, 0.0]
    m = [v / scale for v in m]
    m[2] += m[0] * (-cx - tx) + m[1] * (-cy - ty)
    m[5] += m[3] * (-cx - tx) + m[4] * (-cy - ty)
    m[2] += cx
    m[5] += cy
    return np.array(m, dtype=np.float64).reshape(2, 3)


def _geometric_theta(op_name, magnitude, H, W):
    if op_name == "ShearX":
        return _inverse_affine_matrix(
            [-W * 0.5, -H * 0.5], 0.0, [0.0, 0.0], 1.0,
            [math.degrees(math.atan(magnitude)), 0.0])
    if op_name == "ShearY":
        return _inverse_affine_matrix(
            [-W * 0.5, -H * 0.5], 0.0, [0.0, 0.0], 1.0,
            [0.0, math.degrees(math.atan(magnitude))])
    if op_name == "TranslateX":
        return _inverse_affine_matrix(
            [0.0, 0.0], 0.0, [float(int(magnitude)), 0.0], 1.0, [0.0, 0.0])
    if op_name == "TranslateY":
        return _inverse_affine_matrix(
            [0.0, 0.0], 0.0, [0.0, float(int(magnitude))], 1.0, [0.0, 0.0])
    if op_name == "Rotate":
        return _inverse_affine_matrix(
            [0.0, 0.0], -magnitude, [0.0, 0.0], 1.0, [0.0, 0.0])
    raise ValueError(op_name)


def _cubic(d, a=-0.75):
    d = np.abs(d)
    return np.where(
        d <= 1.0, ((a + 2.0) * d - (a + 3.0)) * d * d + 1.0,
        np.where(d < 2.0, ((a * d - 5.0 * a) * d + 8.0 * a) * d - 4.0 * a, 0.0))


def _build_resample_matrix(theta, H, W):
    """Dense [H*W (in), H*W (out)] bicubic resampling matrix (zeros padding)."""
    ox, oy = (W - 1) / 2.0, (H - 1) / 2.0
    jj, ii = np.meshgrid(np.arange(W), np.arange(H))
    xo = jj - ox
    yo = ii - oy
    sx = theta[0, 0] * xo + theta[0, 1] * yo + theta[0, 2] + ox
    sy = theta[1, 0] * xo + theta[1, 1] * yo + theta[1, 2] + oy
    bx = np.floor(sx).astype(np.int64)
    by = np.floor(sy).astype(np.int64)
    tx = sx - bx
    ty = sy - by
    out_idx = (ii * W + jj).ravel()
    wmat = np.zeros((H * W, H * W), dtype=np.float32)  # [in, out]
    for ky in range(4):
        py = (by - 1 + ky).ravel()
        wy = _cubic(ty + 1 - ky).ravel()
        for kx in range(4):
            px = (bx - 1 + kx).ravel()
            wx = _cubic(tx + 1 - kx).ravel()
            w = wy * wx
            valid = (py >= 0) & (py < H) & (px >= 0) & (px < W)
            in_idx = py * W + px
            np.add.at(wmat, (in_idx[valid], out_idx[valid]), w[valid])
    return wmat


# Cache: (op, magnitude, H, W) -> (bf16 padded W, band_start, kb, HW_pad, tile)
_WMAT_CACHE = {}


def _lane_tile_for(HW):
    if HW >= 512:
        return 512
    if HW >= 256:
        return 256
    return 128


def _get_resample_operands(op_name, magnitude, H, W):
    lane_tile = _lane_tile_for(H * W)
    key = (op_name, round(float(magnitude), 6), H, W, lane_tile)
    if key in _WMAT_CACHE:
        return _WMAT_CACHE[key]

    theta = _geometric_theta(op_name, magnitude, H, W)
    wmat = _build_resample_matrix(theta, H, W)          # (HW, HW) f32
    HW = H * W
    HW_pad = int(math.ceil(HW / lane_tile)) * lane_tile
    wpad = np.zeros((HW_pad, HW_pad), dtype=np.float32)
    wpad[:HW, :HW] = wmat

    tn = tk = lane_tile
    n_tiles = HW_pad // tn
    k_blocks = HW_pad // tk
    band_start = np.zeros((n_tiles,), dtype=np.int64)
    band_width = np.ones((n_tiles,), dtype=np.int64)
    for n in range(n_tiles):
        cols = wpad[:, n * tn:(n + 1) * tn]
        nz = np.nonzero(np.any(cols != 0.0, axis=1))[0]
        if nz.size:
            s = int(nz[0]) // tk
            e = int(nz[-1]) // tk
            band_start[n] = s
            band_width[n] = e - s + 1
    kb = int(band_width.max())
    band_start = np.minimum(band_start, k_blocks - kb).astype(np.int32)

    w_bf16 = jnp.asarray(wpad, dtype=jnp.bfloat16)
    band_dev = jnp.asarray(band_start)
    ops = (w_bf16, band_dev, kb, HW_pad, lane_tile)
    _WMAT_CACHE[key] = ops
    return ops


def _banded_matmul_kernel(band_ref, x_ref, w_ref, o_ref, acc_ref):
    # out[m, n] = sum_k x[m, band[n]+k] @ W[band[n]+k, n]   (MXU, f32 acc)
    del band_ref  # consumed by the index_maps only
    k = pl.program_id(2)

    @pl.when(k == 0)
    def _():
        acc_ref[...] = jnp.zeros_like(acc_ref)

    acc_ref[...] += jnp.dot(x_ref[...], w_ref[...],
                            preferred_element_type=jnp.float32)

    @pl.when(k == pl.num_programs(2) - 1)
    def _():
        o_ref[...] = acc_ref[...].astype(o_ref.dtype)


def affine_resample_pallas(img, op_name, magnitude):
    """Geometric op via banded bicubic-resample matmul on the MXU."""
    N, C, H, W = img.shape
    HW = H * W
    w_bf16, band_dev, kb, HW_pad, lane_tile = _get_resample_operands(
        op_name, float(magnitude), H, W)
    tn = tk = lane_tile

    M = N * C
    tm = 256 if M >= 256 else ((M + 15) // 16) * 16   # bf16 sublane packing
    M_pad = ((M + tm - 1) // tm) * tm

    flat = img.reshape(M, HW).astype(jnp.float32)
    flat = jnp.pad(flat, ((0, M_pad - M), (0, HW_pad - HW)))
    flat_bf16 = flat.astype(jnp.bfloat16)

    grid = (M_pad // tm, HW_pad // tn, kb)
    grid_spec = pltpu.PrefetchScalarGridSpec(
        num_scalar_prefetch=1,
        grid=grid,
        in_specs=[
            pl.BlockSpec((tm, tk), lambda m, n, k, band: (m, band[n] + k)),
            pl.BlockSpec((tk, tn), lambda m, n, k, band: (band[n] + k, n)),
        ],
        out_specs=pl.BlockSpec((tm, tn), lambda m, n, k, band: (m, n)),
        scratch_shapes=[pltpu.VMEM((tm, tn), jnp.float32)],
    )
    out = pl.pallas_call(
        _banded_matmul_kernel,
        out_shape=jax.ShapeDtypeStruct((M_pad, HW_pad), jnp.float32),
        grid_spec=grid_spec,
        compiler_params=pltpu.CompilerParams(
            dimension_semantics=("parallel", "parallel", "arbitrary"),
            vmem_limit_bytes=_VMEM_LIMIT),
    )(band_dev, flat_bf16, w_bf16)
    return out[:M, :HW].reshape(N, C, H, W).astype(img.dtype)


# --------------------------------------------------------------------------
# Pixel-wise path (lane-dense (N, C, H*W), tiled over the batch dimension so
# per-image reductions in Contrast / AutoContrast stay exact).
# --------------------------------------------------------------------------
def _make_pointwise_kernel(op_name, magnitude):
    m = float(magnitude)  # baked-in constant -> folded at trace time

    def kernel(x_ref, o_ref):
        x = x_ref[...].astype(jnp.float32)      # (bn, C, HW)
        if op_name == "Identity":
            y = x
        elif op_name == "Brightness":
            y = jnp.clip(x * (1.0 + m), 0.0, 1.0)
        elif op_name == "Color":
            gray = 0.2989 * x[:, 0:1] + 0.587 * x[:, 1:2] + 0.114 * x[:, 2:3]
            f = 1.0 + m
            y = jnp.clip(f * x + (1.0 - f) * gray, 0.0, 1.0)
        elif op_name == "Contrast":
            gray = 0.2989 * x[:, 0:1] + 0.587 * x[:, 1:2] + 0.114 * x[:, 2:3]
            mean = jnp.mean(gray, axis=(1, 2), keepdims=True)  # per image
            f = 1.0 + m
            y = jnp.clip(f * x + (1.0 - f) * mean, 0.0, 1.0)
        elif op_name == "Solarize":
            thr = m / 255.0  # float-image adaptation of the uint8 threshold
            y = jnp.where(x >= thr, 1.0 - x, x)
        elif op_name == "Posterize":
            shift = 2.0 ** (8.0 - m)  # m = number of bits kept
            q = jnp.floor(x * 255.0)
            y = (jnp.floor(q / shift) * shift) / 255.0
        elif op_name == "AutoContrast":
            mn = jnp.min(x, axis=2, keepdims=True)   # per image-channel
            mx = jnp.max(x, axis=2, keepdims=True)
            scale = 1.0 / jnp.maximum(mx - mn, 1e-12)
            y = jnp.where(mx > mn, jnp.clip((x - mn) * scale, 0.0, 1.0), x)
        else:
            raise ValueError(op_name)
        o_ref[...] = y.astype(o_ref.dtype)

    return kernel


def pointwise_aug_pallas(img, op_name, magnitude):
    N, C, H, W = img.shape
    HW = H * W
    flat = img.reshape(N, C, HW)

    # Largest divisor of N whose block stays ~<= 2 MiB (pipelined, lane-dense).
    per_img_bytes = C * HW * 4
    bn_max = max(1, (2 * 1024 * 1024) // per_img_bytes)
    bn = 1
    for d in range(min(N, bn_max), 0, -1):
        if N % d == 0:
            bn = d
            break

    out = pl.pallas_call(
        _make_pointwise_kernel(op_name, magnitude),
        out_shape=jax.ShapeDtypeStruct((N, C, HW), img.dtype),
        grid=(N // bn,),
        in_specs=[pl.BlockSpec((bn, C, HW), lambda i: (i, 0, 0))],
        out_specs=pl.BlockSpec((bn, C, HW), lambda i: (i, 0, 0)),
        compiler_params=pltpu.CompilerParams(
            dimension_semantics=("parallel",),
            vmem_limit_bytes=_VMEM_LIMIT),
    )(flat)
    return out.reshape(N, C, H, W)


# --------------------------------------------------------------------------
# Augment.forward
# --------------------------------------------------------------------------
def augment_forward(img, seed):
    """TrivialAugmentWide(16, bicubic) forward. img: NCHW float32 in [0,1]."""
    _, _, H, W = img.shape
    space = _augmentation_space(_NUM_BINS)
    names = list(space.keys())

    rng = np.random.default_rng(int(seed))          # host RNG, no device syncs
    op_name = names[int(rng.integers(0, len(names)))]
    magnitudes, signed = space[op_name]
    if magnitudes.ndim > 0:
        magnitude = float(magnitudes[int(rng.integers(0, len(magnitudes)))])
    else:
        magnitude = 0.0
    if signed and int(rng.integers(0, 2)):
        magnitude = -magnitude

    if op_name in _GEOMETRIC:
        return affine_resample_pallas(img, op_name, magnitude)
    return pointwise_aug_pallas(img, op_name, magnitude)


if __name__ == "__main__":
    key = jax.random.PRNGKey(0)
    # Small deterministic example batch: N=2, C=3 (RGB), H=W=16.
    img = jax.random.uniform(key, (2, 3, 16, 16), dtype=jnp.float32)

    # Random TrivialAugmentWide draws (deterministic host sampling).
    for seed in range(4):
        out = jax.block_until_ready(augment_forward(img, seed))
        assert out.shape == img.shape, (out.shape, img.shape)
        assert out.dtype == img.dtype, (out.dtype, img.dtype)
        assert bool(jnp.all(jnp.isfinite(out)))

    # Explicitly exercise both kernel paths regardless of what was sampled.
    out_geo = jax.block_until_ready(affine_resample_pallas(img, "Rotate", 30.0))
    out_pix = jax.block_until_ready(pointwise_aug_pallas(img, "Contrast", 0.5))
    assert out_geo.shape == img.shape and out_geo.dtype == img.dtype
    assert out_pix.shape == img.shape and out_pix.dtype == img.dtype
    assert bool(jnp.all(jnp.isfinite(out_geo)))
    assert bool(jnp.all(jnp.isfinite(out_pix)))

    print("KERNEL_OK")
</pallas_src>

<mosaic_0001>
module attributes {stable_mosaic.version = 11 : i64} {
  func.func @kernel(%arg0: i32, %arg1: memref<2x3x256xf32, #tpu.memory_space<vmem>>, %arg2: memref<2x3x256xf32, #tpu.memory_space<vmem>>) attributes {dimension_semantics = [#tpu.dimension_semantics<parallel>], iteration_bounds = array<i64: 1>, scalar_prefetch = 0 : i64, scratch_operands = 0 : i64, tpu.core_type = #tpu.core_type<tc>, window_params = [{transform_indices = @transform_0, window_bounds = array<i64: 2, 3, 256>}, {transform_indices = @transform_1, window_bounds = array<i64: 2, 3, 256>}]} {
    %c0 = arith.constant 0 : index
    %c0_0 = arith.constant 0 : index
    %c0_1 = arith.constant 0 : index
    %0 = vector.load %arg1[%c0, %c0_0, %c0_1] : memref<2x3x256xf32, #tpu.memory_space<vmem>>, vector<2x3x256xf32>
    %cst = arith.constant 0.333333343 : f32
    %1 = vector.broadcast %cst : f32 to vector<2x3x256xf32>
    %2 = arith.cmpf oge, %0, %1 : vector<2x3x256xf32>
    %cst_2 = arith.constant 1.000000e+00 : f32
    %3 = vector.broadcast %cst_2 : f32 to vector<2x3x256xf32>
    %4 = arith.subf %3, %0 : vector<2x3x256xf32>
    %5 = arith.select %2, %4, %0 : vector<2x3x256xi1>, vector<2x3x256xf32>
    %c0_3 = arith.constant 0 : index
    %c0_4 = arith.constant 0 : index
    %c0_5 = arith.constant 0 : index
    %6 = vector.load %arg2[%c0_3, %c0_4, %c0_5] : memref<2x3x256xf32, #tpu.memory_space<vmem>>, vector<2x3x256xf32>
    tpu.vector_store %arg2[%c0_3, %c0_4, %c0_5], %5 {strides = array<i32>} : memref<2x3x256xf32, #tpu.memory_space<vmem>>, vector<2x3x256xf32>,
    return
  }
  func.func @transform_0(%arg0: i32) -> (i32, i32, i32) {
    %c0_i32 = arith.constant 0 : i32
    %c0_i32_0 = arith.constant 0 : i32
    %c0_i32_1 = arith.constant 0 : i32
    return %arg0, %c0_i32, %c0_i32_0 : i32, i32, i32
  }
  func.func @transform_1(%arg0: i32) -> (i32, i32, i32) {
    %c0_i32 = arith.constant 0 : i32
    %c0_i32_0 = arith.constant 0 : i32
    %c0_i32_1 = arith.constant 0 : i32
    return %arg0, %c0_i32, %c0_i32_0 : i32, i32, i32
  }
}

</mosaic_0001>

<bundles_post_ra>
// kernel: tpu_custom_call.1
= control target key start
LH: loop header
LB: loop body
LE: loop exit
PB: predicated region body
PF: predicated region fallthrough
CT: control target
= control target key end

     0   :  { %s44_s0 = inlined_call_operand.vmem [shape: f32[2,3,256], index: 0, kind: input, shape index: {}]   ;;  %s45_s1 = inlined_call_operand.vmem [shape: f32[2,3,256], index: 1, kind: output, shape index: {}]  }
   0x1   :  { %v8_v0 = vld [vmem:[%s44_s0] sm:$0x77]  ;;  %v9_v1 = vld [vmem:[%s44_s0 + $0x8] sm:$0x77] }
   0x2   :  { %vm10_vm0 = vcmp.ge.f32.partialorder %v8_v0, 0.33333334  ;;  %v12_v2 = vsub.f32 1.0, %v8_v0  ;;  %vm11_vm1 = vcmp.ge.f32.partialorder %v9_v1, 0.33333334  ;;  %v13_v3 = vsub.f32 1.0, %v9_v1 }
   0x4   :  { %v14_v4 = vsel %vm10_vm0, %v12_v2, %v8_v0  ;;  %v15_v5 = vsel %vm11_vm1, %v13_v3, %v9_v1 }
   0x5   :  { %16 = vst [vmem:[%s45_s1] sm:$0x77] %v14_v4  ;;  %17 = vst [vmem:[%s45_s1 + $0x8] sm:$0x77] %v15_v5 }

</bundles_post_ra>
